<compile_context>
chip_gen: v7x
topology: tpu7x:2x2x1
jax: 0.10.0
libtpu: 0.0.40
codegen_flags: <defaults>
</compile_context>

<pallas_src>
import jax
import jax.numpy as jnp
from jax.experimental import pallas as pl
from jax.experimental.pallas import tpu as pltpu

ORGANS = ("bowel", "extra", "liver", "kidney", "spleen")

F_FEAT = 1000      # backbone-stub feature width (efficientnet_b5 classifier out)
NECK = 32          # per-organ neck width
NC_PAD = 128       # padded output lane width (>= sum(num_classes)) -> unmasked stores
TM = 8             # batch (sublane) tile; raise to 128+ for large-batch serving


# ----------------------------------------------------------------------------
# Single fused kernel: f32 GAP -> composed affine map (one MXU matmul + bias)
# ----------------------------------------------------------------------------

def _fused_forward_kernel(x_ref, w_ref, b_ref, o_ref):
    # x: [TM, C, HW] f32   (natural activation layout)
    # w: [C, NC_PAD] bf16  (backbone-stub @ necks @ heads, pre-composed, exact)
    # b: [1, NC_PAD] f32
    # o: [TM, NC_PAD] f32
    pooled = jnp.mean(x_ref[...], axis=-1)                   # [TM, C] f32 GAP
    o_ref[...] = (
        jnp.dot(pooled.astype(jnp.bfloat16), w_ref[...],
                preferred_element_type=jnp.float32)
        + b_ref[...]
    )


# ----------------------------------------------------------------------------
# Parameter construction (PyTorch Linear default init: U(-1/sqrt(fan_in), ..)).
# Weights stored as [in, out].
# ----------------------------------------------------------------------------

def _make_linear_params(key, d_in, d_out):
    kw, kb = jax.random.split(key)
    bound = 1.0 / jnp.sqrt(jnp.float32(d_in))
    w = jax.random.uniform(kw, (d_in, d_out), jnp.float32, -bound, bound)
    b = jax.random.uniform(kb, (1, d_out), jnp.float32, -bound, bound)
    return w, b


def make_model_params(key, in_channels, num_classes):
    """Per-layer f32 params (used by the reference and by pack_params)."""
    keys = jax.random.split(key, 1 + 2 * len(num_classes))
    params = {}
    params["backbone"] = _make_linear_params(keys[0], in_channels, F_FEAT)
    for i, organ in enumerate(ORGANS):
        params[f"neck_{organ}"] = _make_linear_params(keys[1 + 2 * i], F_FEAT, NECK)
        params[f"head_{organ}"] = _make_linear_params(
            keys[2 + 2 * i], NECK, num_classes[organ])
    return params


def pack_params(params, num_classes):
    """Exactly pre-compose the affine chain into one [C, NC_PAD] weight."""
    wb, bb = params["backbone"]                                   # [C, F], [1, F]

    wn_all = jnp.concatenate(
        [params[f"neck_{o}"][0] for o in ORGANS], axis=1)         # [F, 160]
    bn_all = jnp.concatenate(
        [params[f"neck_{o}"][1] for o in ORGANS], axis=1)         # [1, 160]

    wh_all = jnp.zeros((NECK * len(ORGANS), NC_PAD), jnp.float32)  # block-diag
    bh_all = jnp.zeros((1, NC_PAD), jnp.float32)
    off = 0
    for i, organ in enumerate(ORGANS):
        wh, bh = params[f"head_{organ}"]                          # [32, nc], [1, nc]
        nc = num_classes[organ]
        wh_all = wh_all.at[i * NECK:(i + 1) * NECK, off:off + nc].set(wh)
        bh_all = bh_all.at[:, off:off + nc].set(bh)
        off += nc

    # No nonlinearity anywhere in the chain -> composition is exact (f32).
    w_total = wb @ wn_all @ wh_all                                # [C, NC_PAD]
    b_total = bb @ wn_all @ wh_all + bn_all @ wh_all + bh_all     # [1, NC_PAD]

    return {"w": w_total.astype(jnp.bfloat16),                    # [C, NC_PAD]
            "b": b_total}                                         # [1, NC_PAD] f32


# ----------------------------------------------------------------------------
# Forward pass (one pallas_call, batch-parallel grid, outputs sliced per organ)
# ----------------------------------------------------------------------------

def forward(packed, x, num_classes):
    B, C, H, W = x.shape
    HW = H * W
    Bp = ((B + TM - 1) // TM) * TM
    x3 = x.reshape(B, C, HW)                       # free reshape, no dtype copy
    if Bp != B:
        x3 = jnp.pad(x3, ((0, Bp - B), (0, 0), (0, 0)))

    cost = pl.CostEstimate(
        flops=2 * Bp * C * HW + 2 * Bp * C * NC_PAD,
        transcendentals=0,
        bytes_accessed=Bp * C * HW * 4 + C * NC_PAD * 2
        + NC_PAD * 4 + Bp * NC_PAD * 4,
    )

    out_all = pl.pallas_call(
        _fused_forward_kernel,
        out_shape=jax.ShapeDtypeStruct((Bp, NC_PAD), jnp.float32),
        grid=(Bp // TM,),
        in_specs=[
            pl.BlockSpec((TM, C, HW), lambda i: (i, 0, 0)),
            pl.BlockSpec((C, NC_PAD), lambda i: (0, 0)),
            pl.BlockSpec((1, NC_PAD), lambda i: (0, 0)),
        ],
        out_specs=pl.BlockSpec((TM, NC_PAD), lambda i: (i, 0)),
        compiler_params=pltpu.CompilerParams(
            dimension_semantics=("parallel",)),
        cost_estimate=cost,
    )(x3, packed["w"], packed["b"])

    outs, off = [], 0
    for organ in ORGANS:
        nc = num_classes[organ]
        outs.append(out_all[:B, off:off + nc])
        off += nc
    return tuple(outs)


def forward_reference(params, x):
    """Pure-JAX f32 layer-by-layer reference for correctness checking."""
    pooled = jnp.mean(x.reshape(x.shape[0], x.shape[1], -1), axis=-1)
    wb, bb = params["backbone"]
    feat = pooled @ wb + bb
    outs = []
    for organ in ORGANS:
        wn, bn = params[f"neck_{organ}"]
        wh, bh = params[f"head_{organ}"]
        outs.append((feat @ wn + bn) @ wh + bh)
    return tuple(outs)


# ----------------------------------------------------------------------------
# Main
# ----------------------------------------------------------------------------

if __name__ == "__main__":
    key = jax.random.PRNGKey(0)
    k_params, k_x = jax.random.split(key)

    # small shapes: batch=2, channels=4, spatial=16x16
    B, C, H, W = 2, 4, 16, 16
    num_classes = {"bowel": 2, "extra": 2, "liver": 3, "kidney": 3, "spleen": 3}

    params = make_model_params(k_params, C, num_classes)
    packed = pack_params(params, num_classes)
    x = jax.random.normal(k_x, (B, C, H, W), jnp.float32)

    outs = forward(packed, x, num_classes)
    outs = jax.block_until_ready(outs)

    refs = forward_reference(params, x)
    for o, r, organ in zip(outs, refs, ORGANS):
        assert o.shape == (B, num_classes[organ]), (organ, o.shape)
        assert jnp.allclose(o, r, rtol=2e-2, atol=1e-2), f"mismatch on {organ}"

    print("KERNEL_OK")
</pallas_src>

<mosaic_0001>
module attributes {stable_mosaic.version = 11 : i64} {
  func.func @_fused_forward_kernel(%arg0: i32, %arg1: memref<8x4x256xf32, #tpu.memory_space<vmem>>, %arg2: memref<4x128xbf16, #tpu.memory_space<vmem>>, %arg3: memref<1x128xf32, #tpu.memory_space<vmem>>, %arg4: memref<8x128xf32, #tpu.memory_space<vmem>>) attributes {dimension_semantics = [#tpu.dimension_semantics<parallel>], iteration_bounds = array<i64: 1>, scalar_prefetch = 0 : i64, scratch_operands = 0 : i64, tpu.core_type = #tpu.core_type<tc>, window_params = [{transform_indices = @transform_0, window_bounds = array<i64: 8, 4, 256>}, {pipeline_mode = #tpu.pipeline_mode<synchronous>, transform_indices = @transform_1, window_bounds = array<i64: 4, 128>}, {pipeline_mode = #tpu.pipeline_mode<synchronous>, transform_indices = @transform_2, window_bounds = array<i64: 1, 128>}, {transform_indices = @transform_3, window_bounds = array<i64: 8, 128>}]} {
    %c0 = arith.constant 0 : index
    %c0_0 = arith.constant 0 : index
    %c0_1 = arith.constant 0 : index
    %0 = vector.load %arg1[%c0, %c0_0, %c0_1] : memref<8x4x256xf32, #tpu.memory_space<vmem>>, vector<8x4x256xf32>
    %cst = arith.constant dense<0.000000e+00> : vector<8x4xf32>
    %1 = vector.multi_reduction <add>, %0, %cst [2] : vector<8x4x256xf32> to vector<8x4xf32>
    %cst_2 = arith.constant 2.560000e+02 : f32
    %2 = vector.broadcast %cst_2 : f32 to vector<8x4xf32>
    %3 = arith.divf %1, %2 : vector<8x4xf32>
    %4 = arith.truncf %3 : vector<8x4xf32> to vector<8x4xbf16>
    %c0_3 = arith.constant 0 : index
    %c0_4 = arith.constant 0 : index
    %5 = vector.load %arg2[%c0_3, %c0_4] : memref<4x128xbf16, #tpu.memory_space<vmem>>, vector<4x128xbf16>
    %cst_5 = arith.constant dense<0.000000e+00> : vector<8x128xf32>
    %6 = tpu.matmul %4, %5, %cst_5 {dimension_numbers = #tpu.dot_dimension_numbers<[1], [0], [0], [1], [0, 0, 1, 1], [], []>} : vector<8x4xbf16>, vector<4x128xbf16>, vector<8x128xf32> -> vector<8x128xf32>
    %c0_6 = arith.constant 0 : index
    %c0_7 = arith.constant 0 : index
    %7 = vector.load %arg3[%c0_6, %c0_7] : memref<1x128xf32, #tpu.memory_space<vmem>>, vector<1x128xf32>
    %8 = vector.broadcast %7 : vector<1x128xf32> to vector<8x128xf32>
    %9 = arith.addf %6, %8 : vector<8x128xf32>
    %c0_8 = arith.constant 0 : index
    %c0_9 = arith.constant 0 : index
    %10 = vector.load %arg4[%c0_8, %c0_9] : memref<8x128xf32, #tpu.memory_space<vmem>>, vector<8x128xf32>
    tpu.vector_store %arg4[%c0_8, %c0_9], %9 {strides = array<i32>} : memref<8x128xf32, #tpu.memory_space<vmem>>, vector<8x128xf32>,
    return
  }
  func.func @transform_0(%arg0: i32) -> (i32, i32, i32) {
    %c0_i32 = arith.constant 0 : i32
    %c0_i32_0 = arith.constant 0 : i32
    %c0_i32_1 = arith.constant 0 : i32
    return %arg0, %c0_i32, %c0_i32_0 : i32, i32, i32
  }
  func.func @transform_1(%arg0: i32) -> (i32, i32) {
    %c0_i32 = arith.constant 0 : i32
    %c0_i32_0 = arith.constant 0 : i32
    %c0_i32_1 = arith.constant 0 : i32
    return %c0_i32, %c0_i32_0 : i32, i32
  }
  func.func @transform_2(%arg0: i32) -> (i32, i32) {
    %c0_i32 = arith.constant 0 : i32
    %c0_i32_0 = arith.constant 0 : i32
    %c0_i32_1 = arith.constant 0 : i32
    return %c0_i32, %c0_i32_0 : i32, i32
  }
  func.func @transform_3(%arg0: i32) -> (i32, i32) {
    %c0_i32 = arith.constant 0 : i32
    %c0_i32_0 = arith.constant 0 : i32
    return %arg0, %c0_i32 : i32, i32
  }
}

</mosaic_0001>

<bundles_post_ra>
// kernel: tpu_custom_call.1
= control target key start
LH: loop header
LB: loop body
LE: loop exit
PB: predicated region body
PF: predicated region fallthrough
CT: control target
= control target key end

     0   :  { %8 = vsyncpa [#allocation3], 0  ;;  %s401_s0 = inlined_call_operand.hbm [shape: f32[8,4,256], index: 0, kind: input, shape index: {}]   ;;  %s402_s1 = inlined_call_operand.vmem [shape: bf16[4,128], index: 1, kind: input, shape index: {}]   ;;  %s403_s2 = inlined_call_operand.vmem [shape: f32[1,128], index: 2, kind: input, shape index: {}]   ;;  %s404_s3 = inlined_call_operand.hbm [shape: f32[8,128], index: 3, kind: output, shape index: {}]  }
   0x1   :  { %9 = vsyncpa [#allocation4], 0  ;;  %s329_s12 = smov [#allocation2]   ;;  %s281_s16 = scalar_lea.hbm %s401_s0, 1024 }
   0x2   :  { %s15_s13 = sshll.u32 %s329_s12, 4  ;;  %p282_p0 = scmp.ne.s32.totalorder %s401_s0, %s281_s16  ;;  %s16_s13 = int_to_ptr.vmem [resolvable:$true] %s15_s13 }
   0x3   :  { %p285_p1 = scmp.lt.u32.totalorder %s281_s16, %s401_s0 }
   0x5   :  { %p287_p2 = pnand %p285_p1, %p282_p0 }
   0x7   :  { %290 = shalt.err (!%p287_p2)
}
   0x8   :  { %s291_s21 = scalar_lea.vmem %s16_s13, 1024  ;;  %p296_p4 = scmp.lt.s32.totalorder %s16_s13, %s16_s13 }
   0x9   :  { %p292_p3 = scmp.ne.s32.totalorder %s16_s13, %s291_s21  ;;  %p297_p5 = scmp.lt.s32.totalorder %s291_s21, %s291_s21 }
   0xb   :  { %p298_p6 = por %p297_p5, %p296_p4 }
   0xd   :  { %p299_p7 = pnand %p298_p6, %p292_p3 }
   0xf   :  { %302 = shalt.err (!%p299_p7)
}
  0x10   :  { %s330_s22 = smov 128   ;;  %s331_s23 = smov 8  }
  0x11   :  { %21 = dma.hbm_to_vmem [thread:$0]  %s401_s0, 1024, %s16_s13, [#allocation3], %s330_s22, %s330_s22, %s331_s23  }
  0x12   :  { %325 = dma.done.wait [#allocation3], 1024  }
  0x13   :  { %326 = vsyncadd [#allocation3], 4294966272  ;;  %vm62_vm0 = vcmask 1043456   ;;  %v30_v0 = vld [vmem:[#allocation2] sm:$0xff]  ;;  %v32_v1 = vld [vmem:[#allocation2 + $0x10] sm:$0xff]  ;;  %vm197_vm1 = vcmask 1041408   ;;  %v144_v43 = vlaneseq }
  0x14   :  { %v31_v2 = vld [vmem:[#allocation2 + $0x8] sm:$0xff]  ;;  %v46_v3 = vcombine.high %v30_v0, %v30_v0  ;;  %v63_v4 = vsel %vm62_vm0, %v30_v0, 0.0  ;;  %v48_v5 = vcombine.high %v32_v1, %v32_v1  ;;  %v73_v6 = vsel %vm62_vm0, %v32_v1, 0.0  ;;  %v33_v7 = vld [vmem:[#allocation2 + $0x18] sm:$0xff]  ;;  %v34_v8 = vld [vmem:[#allocation2 + $0x20] sm:$0xff]  ;;  %s334_s28 = smov [#allocation5]  }
  0x15   :  { %v47_v9 = vcombine.high %v31_v2, %v31_v2  ;;  %v68_v10 = vsel %vm62_vm0, %v31_v2, 0.0  ;;  %v49_v11 = vcombine.high %v33_v7, %v33_v7  ;;  %v35_v12 = vld [vmem:[#allocation2 + $0x28] sm:$0xff]  ;;  %v78_v15 = vsel %vm62_vm0, %v33_v7, 0.0  ;;  %v36_v21 = vld [vmem:[#allocation2 + $0x30] sm:$0xff]  ;;  %v37_v22 = vld [vmem:[#allocation2 + $0x38] sm:$0xff]  ;;  %s248_s29 = sshll.u32 %s334_s28, 4  ;;  %s249_s29 = int_to_ptr.vmem [resolvable:$true] %s248_s29 }
  0x16   :  { %v64_v13 = vsel %vm62_vm0, %v46_v3, 0.0  ;;  %v74_v14 = vsel %vm62_vm0, %v48_v5, 0.0  ;;  %v50_v16 = vcombine.high %v34_v8, %v34_v8  ;;  %v51_v23 = vcombine.high %v35_v12, %v35_v12  ;;  %v120_v40 = vld [vmem:[%s402_s1] sm:$0x3]  ;;  %s303_s30 = scalar_lea.vmem %s249_s29, 128  ;;  %p308_p9 = scmp.lt.s32.totalorder %s249_s29, %s249_s29 }
  0x17   :  { %v65_v17 = vadd.f32 %v64_v13, %v63_v4  ;;  %v75_v18 = vadd.f32 %v74_v14, %v73_v6  ;;  %v69_v19 = vsel %vm62_vm0, %v47_v9, 0.0  ;;  %v79_v20 = vsel %vm62_vm0, %v49_v11, 0.0  ;;  %p304_p8 = scmp.ne.s32.totalorder %s249_s29, %s303_s30  ;;  %p309_p10 = scmp.lt.s32.totalorder %s303_s30, %s303_s30 }
  0x18   :  { %v70_v24 = vadd.f32 %v69_v19, %v68_v10  ;;  %v80_v25 = vadd.f32 %v79_v20, %v78_v15  ;;  %v83_v26 = vsel %vm62_vm0, %v34_v8, 0.0  ;;  %v84_v27 = vsel %vm62_vm0, %v50_v16, 0.0 }
  0x19   :  { %66 = vadd.xlane.f32.xlu0 %v65_v17  ;;  %76 = vadd.xlane.f32.xlu1 %v75_v18  ;;  %v88_v28 = vsel %vm62_vm0, %v35_v12, 0.0  ;;  %v89_v29 = vsel %vm62_vm0, %v51_v23, 0.0  ;;  %v52_v30 = vcombine.high %v36_v21, %v36_v21  ;;  %v53_v31 = vcombine.high %v37_v22, %v37_v22  ;;  %p310_p11 = por %p309_p10, %p308_p9 }
  0x1a   :  { %v85_v32 = vadd.f32 %v84_v27, %v83_v26  ;;  %v90_v33 = vadd.f32 %v89_v29, %v88_v28  ;;  %v93_v34 = vsel %vm62_vm0, %v36_v21, 0.0  ;;  %v98_v36 = vsel %vm62_vm0, %v37_v22, 0.0 }
  0x1b   :  { %v94_v35 = vsel %vm62_vm0, %v52_v30, 0.0  ;;  %v99_v37 = vsel %vm62_vm0, %v53_v31, 0.0  ;;  %v332_v41 = vmov 0.0   ;;  %v199_v42 = vsel %vm197_vm1, %v120_v40, 0  ;;  %v257_v31 = vld [vmem:[%s403_s2] ss:$0 sm:$0xff]  ;;  %p311_p12 = pnand %p310_p11, %p304_p8 }
  0x1c   :  { %v95_v38 = vadd.f32 %v94_v35, %v93_v34  ;;  %v100_v39 = vadd.f32 %v99_v37, %v98_v36  ;;  %261 = vmatprep.subr.bf16.mxu0 %v332_v41  ;;  %vm333_vm2 = vmmov 0   ;;  %v145_v48 = vand.u32 127, %v144_v43 }
  0x1d   :  { %71 = vadd.xlane.f32.xlu0 %v70_v24  ;;  %81 = vadd.xlane.f32.xlu1 %v80_v25  ;;  %v147_v49 = vshrl.u32 %v144_v43, 7  ;;  %vm178_vm3 = vcmask 1041409   ;;  %vm180_vm4 = vcmask 1042434   ;;  %vm182_vm5 = vcmask 1043459  }
  0x1e   :  { %262 = vmatpush3.bf16.msra.mxu0 %v199_v42  ;;  %263 = vmatprep.mubr.msk.bf16.mxu0 %vm333_vm2, %v332_v41  ;;  %vm184_vm6 = vcmask 1044484   ;;  %vm186_vm7 = vcmask 1045509   ;;  %vm188_vm8 = vcmask 1046534   ;;  %vm190_vm9 = vcmask 1047559  }
  0x1f   :  { %v148_v56 = vsub.s32 %v145_v48, %v147_v49  ;;  %vm193_vm10 = vcmask 31744  }
  0x21   :  { %86 = vadd.xlane.f32.xlu0 %v85_v32  ;;  %91 = vadd.xlane.f32.xlu1 %v90_v33 }
  0x25   :  { %96 = vadd.xlane.f32.xlu0 %v95_v38  ;;  %101 = vadd.xlane.f32.xlu1 %v100_v39 }
  0xa6   :  { %v67_v44 = vpop.xlane.xlu0 %66  ;;  %v77_v45 = vpop.xlane.xlu1 %76 }
  0xa7   :  { %v104_v46 = vmul.f32 0.00390625, %v67_v44  ;;  %v106_v47 = vmul.f32 0.00390625, %v77_v45 }
  0xa9   :  { %v112_v50 = vpack.c.bf16 %v104_v46, %v104_v46  ;;  %v114_v51 = vpack.c.bf16 %v106_v47, %v106_v47 }
  0xaa   :  { %v72_v52 = vpop.xlane.xlu0 %71  ;;  %v82_v53 = vpop.xlane.xlu1 %81 }
  0xab   :  { %v105_v54 = vmul.f32 0.00390625, %v72_v52  ;;  %v107_v55 = vmul.f32 0.00390625, %v82_v53  ;;  %v136_v57 = vunpack.c.l.b16 %v112_v50  ;;  %v138_v60 = vunpack.c.l.b16 %v114_v51 }
  0xad   :  { %v113_v58 = vpack.c.bf16 %v105_v54, %v105_v54  ;;  %v115_v59 = vpack.c.bf16 %v107_v55, %v107_v55  ;;  %v149_v3 = vrot.slane %v136_v57, %v148_v56  ;;  %v157_v8 = vrot.slane %v138_v60, %v148_v56 }
  0xae   :  { %v87_v61 = vpop.xlane.xlu0 %86  ;;  %v92_v62 = vpop.xlane.xlu1 %91 }
  0xaf   :  { %v137_v63 = vunpack.c.l.b16 %v113_v58  ;;  %v139_v0 = vunpack.c.l.b16 %v115_v59  ;;  %v108_v1 = vmul.f32 0.00390625, %v87_v61  ;;  %v109_v2 = vmul.f32 0.00390625, %v92_v62 }
  0xb1   :  { %v153_v4 = vrot.slane %v137_v63, %v148_v56  ;;  %v161_v5 = vrot.slane %v139_v0, %v148_v56  ;;  %v116_v6 = vpack.c.bf16 %v108_v1, %v108_v1  ;;  %v117_v7 = vpack.c.bf16 %v109_v2, %v109_v2 }
  0xb2   :  { %v97_v9 = vpop.xlane.xlu0 %96  ;;  %v102_v10 = vpop.xlane.xlu1 %101 }
  0xb3   :  { %v179_v11 = vsel %vm178_vm3, %v153_v4, %v149_v3  ;;  %v140_v12 = vunpack.c.l.b16 %v116_v6  ;;  %v141_v13 = vunpack.c.l.b16 %v117_v7  ;;  %v110_v14 = vmul.f32 0.00390625, %v97_v9 }
  0xb4   :  { %v181_v15 = vsel %vm180_vm4, %v157_v8, %v179_v11  ;;  %v111_v16 = vmul.f32 0.00390625, %v102_v10 }
  0xb5   :  { %v183_v17 = vsel %vm182_vm5, %v161_v5, %v181_v15  ;;  %v165_v18 = vrot.slane %v140_v12, %v148_v56  ;;  %v118_v19 = vpack.c.bf16 %v110_v14, %v110_v14  ;;  %v169_v20 = vrot.slane %v141_v13, %v148_v56 }
  0xb6   :  { %v119_v21 = vpack.c.bf16 %v111_v16, %v111_v16 }
  0xb7   :  { %v185_v22 = vsel %vm184_vm6, %v165_v18, %v183_v17  ;;  %v142_v23 = vunpack.c.l.b16 %v118_v19 }
  0xb8   :  { %v143_v24 = vunpack.c.l.b16 %v119_v21  ;;  %v187_v26 = vsel %vm186_vm7, %v169_v20, %v185_v22 }
  0xb9   :  { %v173_v25 = vrot.slane %v142_v23, %v148_v56 }
  0xba   :  { %v177_v27 = vrot.slane %v143_v24, %v148_v56 }
  0xbb   :  { %v189_v28 = vsel %vm188_vm8, %v173_v25, %v187_v26 }
  0xbc   :  { %v191_v29 = vsel %vm190_vm9, %v177_v27, %v189_v28 }
  0xbd   :  { %v192_v30 = vpack.c.b16 %v191_v29, %v191_v29 }
  0xbf   :  { %264 = vmatmul.mubr.msk.bf16.vlgmr.msra.gmra.mrb[0].mxu0 %vm193_vm10, %v192_v30 }
 0x192   :  { %v235_v32 = vpop.f32.mrb[0].mxu0 }
 0x193   :  { %v236_v33 = vadd.f32 %v257_v31, %v235_v32  ;;  %v265_v34 = vpop.f32.mrb[1].mxu0 }
 0x194   :  { %v238_v35 = vpop.f32.mrb[2].mxu0 }
 0x195   :  { %241 = vst [vmem:[#allocation5] sm:$0xff] %v236_v33  ;;  %v266_v36 = vpop.f32.mrb[3].mxu0 }
 0x196   :  { %314 = shalt.err (!%p311_p12)
}
 0x197   :  { %s315_s2 = scalar_lea.hbm %s404_s3, 128 }
 0x198   :  { %p316_p13 = scmp.ne.s32.totalorder %s404_s3, %s315_s2  ;;  %p319_p0 = scmp.lt.u32.totalorder %s315_s2, %s404_s3 }
 0x19a   :  { %p321_p1 = pnand %p319_p0, %p316_p13 }
 0x19c   :  { %324 = shalt.err (!%p321_p1)
}
 0x19d   :  { %251 = dma.vmem_to_hbm [thread:$0]  %s249_s29, 128, %s404_s3, [#allocation4]  }
 0x19e   :  { %327 = dma.done.wait [#allocation4], 128  }
 0x19f   :  { %328 = vsyncadd [#allocation4], 4294967168 }
 0x1a0   :  { %255 = vsyncpa [#allocation3], 1 }
 0x1a1   :  { %256 = vsyncpa [#allocation4], 1 }

</bundles_post_ra>
